<compile_context>
chip_gen: v7x
topology: tpu7x:2x2x1
jax: 0.10.0
libtpu: 0.0.40
codegen_flags: <defaults>
</compile_context>

<pallas_src>
import functools

import jax
import jax.numpy as jnp
import numpy as np
from jax import lax
from jax.experimental import pallas as pl
from jax.experimental.pallas import tpu as pltpu


def sparse_ngcn_kernel(x_ref, w_ref, b_ref, gamma_ref, beta_ref, a_ref, out_ref,
                       *, iterations, eps):
    # ---- feature transform: (N, Fin) @ (Fin, Fout) on the MXU ----
    h = jnp.dot(x_ref[...], w_ref[...], preferred_element_type=jnp.float32)
    h = h + b_ref[...]                                   # bias (1, Fout) broadcast

    # ---- LayerNorm over the feature (lane) dimension ----
    mean = jnp.mean(h, axis=-1, keepdims=True)
    hc = h - mean
    var = jnp.mean(hc * hc, axis=-1, keepdims=True)
    h = hc * lax.rsqrt(var + eps)
    h = h * gamma_ref[...] + beta_ref[...]

    # ---- dropout (identity at inference) + ReLU ----
    # TODO(synk): training-mode F.dropout (random mask + 1/(1-p) scaling) not implemented.
    h = jnp.maximum(h, 0.0)

    # ---- (iterations - 1) adjacency propagations: (N, N) @ (N, Fout) on the MXU ----
    for _ in range(iterations - 1):
        h = jnp.dot(a_ref[...], h, preferred_element_type=jnp.float32)

    out_ref[...] = h.astype(out_ref.dtype)


def coo_to_dense(indices, values, shape):
    """Scatter-add a COO (2, nnz) / (nnz,) sparse matrix to dense (== spmm semantics)."""
    return jnp.zeros(shape, values.dtype).at[indices[0], indices[1]].add(values)


@functools.partial(jax.jit, static_argnames=("n_nodes", "iterations"))
def sparse_ngcn_forward(adj_indices, adj_values, feat_indices, feat_values,
                        weight, bias, ln_gamma, ln_beta, *, n_nodes, iterations):
    in_channels, out_channels = weight.shape

    # Densify the sparse operands (shapes must be static in JAX, so n_nodes is
    # passed explicitly instead of being derived from max(indices) + 1).
    x_dense = coo_to_dense(feat_indices, feat_values, (n_nodes, in_channels))
    a_dense = coo_to_dense(adj_indices, adj_values, (n_nodes, n_nodes))

    b = bias.reshape(1, out_channels)
    gamma = ln_gamma.reshape(1, out_channels)
    beta = ln_beta.reshape(1, out_channels)

    kernel = functools.partial(sparse_ngcn_kernel, iterations=iterations, eps=1e-5)
    vmem = pl.BlockSpec(memory_space=pltpu.MemorySpace.VMEM)   # whole array, VMEM-resident

    out = pl.pallas_call(
        kernel,
        out_shape=jax.ShapeDtypeStruct((n_nodes, out_channels), jnp.float32),
        in_specs=[vmem, vmem, vmem, vmem, vmem, vmem],
        out_specs=vmem,
    )(x_dense, weight, b, gamma, beta, a_dense)
    return out


# ---------------------------- pure-JAX reference ----------------------------

def _spmm_ref(indices, values, n_rows, dense):
    rows, cols = indices[0], indices[1]
    return jax.ops.segment_sum(values[:, None] * dense[cols], rows, num_segments=n_rows)


def sparse_ngcn_reference(adj_indices, adj_values, feat_indices, feat_values,
                          weight, bias, ln_gamma, ln_beta, *, n_nodes, iterations):
    h = _spmm_ref(feat_indices, feat_values, n_nodes, weight) + bias.reshape(1, -1)
    mean = h.mean(-1, keepdims=True)
    var = ((h - mean) ** 2).mean(-1, keepdims=True)
    h = (h - mean) * lax.rsqrt(var + 1e-5) * ln_gamma + ln_beta
    h = jnp.maximum(h, 0.0)                               # dropout is identity at inference
    for _ in range(iterations - 1):
        h = _spmm_ref(adj_indices, adj_values, n_nodes, h)
    return h


if __name__ == "__main__":
    # Small shapes consistent with the module: 128 nodes, 64 -> 128 channels, 3 iterations.
    N, F_IN, F_OUT = 128, 64, 128
    ITERATIONS = 3
    NNZ_X, NNZ_A = 512, 384        # sparse feature / adjacency nonzeros

    key = jax.random.PRNGKey(0)
    ks = jax.random.split(key, 10)

    feat_rows = jax.random.randint(ks[0], (NNZ_X,), 0, N, dtype=jnp.int32)
    feat_cols = jax.random.randint(ks[1], (NNZ_X,), 0, F_IN, dtype=jnp.int32)
    feat_indices = jnp.stack([feat_rows, feat_cols])
    feat_values = jax.random.normal(ks[2], (NNZ_X,), jnp.float32)

    adj_rows = jax.random.randint(ks[3], (NNZ_A,), 0, N, dtype=jnp.int32)
    adj_cols = jax.random.randint(ks[4], (NNZ_A,), 0, N, dtype=jnp.int32)
    adj_indices = jnp.stack([adj_rows, adj_cols])
    adj_values = jax.random.uniform(ks[5], (NNZ_A,), jnp.float32, 0.0, 0.5)

    limit = float(np.sqrt(6.0 / (F_IN + F_OUT)))           # xavier_uniform
    weight = jax.random.uniform(ks[6], (F_IN, F_OUT), jnp.float32, -limit, limit)
    bias = jax.random.uniform(ks[7], (1, F_OUT), jnp.float32, -limit, limit)
    ln_gamma = 1.0 + 0.05 * jax.random.normal(ks[8], (F_OUT,), jnp.float32)
    ln_beta = 0.05 * jax.random.normal(ks[9], (F_OUT,), jnp.float32)

    out = sparse_ngcn_forward(adj_indices, adj_values, feat_indices, feat_values,
                              weight, bias, ln_gamma, ln_beta,
                              n_nodes=N, iterations=ITERATIONS)
    jax.block_until_ready(out)

    ref = sparse_ngcn_reference(adj_indices, adj_values, feat_indices, feat_values,
                                weight, bias, ln_gamma, ln_beta,
                                n_nodes=N, iterations=ITERATIONS)
    np.testing.assert_allclose(np.asarray(out), np.asarray(ref), rtol=1e-3, atol=1e-3)

    print("KERNEL_OK")
</pallas_src>

<mosaic_0001>
module attributes {stable_mosaic.version = 11 : i64} {
  func.func private @main(%arg0: i32) attributes {dimension_semantics = [#tpu.dimension_semantics<core_parallel>], iteration_bounds = array<i64: 2>, tpu.core_type = #tpu.core_type<sc_scalar_subcore>, window_params = []} {
    return
  }
}

module attributes {stable_mosaic.version = 11 : i64} {
  func.func private @main(%arg0: i32) attributes {dimension_semantics = [#tpu.dimension_semantics<core_parallel>], iteration_bounds = array<i64: 2>, tpu.core_type = #tpu.core_type<sc_scalar_subcore>, window_params = []} {
    return
  }
}

module attributes {stable_mosaic.version = 11 : i64} {
  func.func @sparse_ngcn_kernel(%arg0: memref<128x64xf32, #tpu.memory_space<vmem>>, %arg1: memref<64x128xf32, #tpu.memory_space<vmem>>, %arg2: memref<1x128xf32, #tpu.memory_space<vmem>>, %arg3: memref<1x128xf32, #tpu.memory_space<vmem>>, %arg4: memref<1x128xf32, #tpu.memory_space<vmem>>, %arg5: memref<128x128xf32, #tpu.memory_space<vmem>>, %arg6: memref<128x128xf32, #tpu.memory_space<vmem>>) attributes {dimension_semantics = [], scalar_prefetch = 0 : i64, scratch_operands = 0 : i64, tpu.core_type = #tpu.core_type<tc>} {
    %c0 = arith.constant 0 : index
    %c0_0 = arith.constant 0 : index
    %0 = vector.load %arg0[%c0, %c0_0] : memref<128x64xf32, #tpu.memory_space<vmem>>, vector<128x64xf32>
    %c0_1 = arith.constant 0 : index
    %c0_2 = arith.constant 0 : index
    %1 = vector.load %arg1[%c0_1, %c0_2] : memref<64x128xf32, #tpu.memory_space<vmem>>, vector<64x128xf32>
    %cst = arith.constant dense<0.000000e+00> : vector<128x128xf32>
    %2 = tpu.matmul %0, %1, %cst {dimension_numbers = #tpu.dot_dimension_numbers<[1], [0], [0], [1], [0, 0, 1, 1], [], []>} : vector<128x64xf32>, vector<64x128xf32>, vector<128x128xf32> -> vector<128x128xf32>
    %c0_3 = arith.constant 0 : index
    %c0_4 = arith.constant 0 : index
    %3 = vector.load %arg2[%c0_3, %c0_4] : memref<1x128xf32, #tpu.memory_space<vmem>>, vector<1x128xf32>
    %4 = vector.broadcast %3 : vector<1x128xf32> to vector<128x128xf32>
    %5 = arith.addf %2, %4 : vector<128x128xf32>
    %cst_5 = arith.constant dense<0.000000e+00> : vector<128xf32>
    %6 = vector.multi_reduction <add>, %5, %cst_5 [1] : vector<128x128xf32> to vector<128xf32>
    %7 = vector.shape_cast %6 : vector<128xf32> to vector<128x1xf32>
    %cst_6 = arith.constant 1.280000e+02 : f32
    %8 = vector.broadcast %cst_6 : f32 to vector<128x1xf32>
    %9 = arith.divf %7, %8 : vector<128x1xf32>
    %10 = vector.broadcast %9 : vector<128x1xf32> to vector<128x128xf32>
    %11 = arith.subf %5, %10 : vector<128x128xf32>
    %12 = arith.mulf %11, %11 : vector<128x128xf32>
    %cst_7 = arith.constant dense<0.000000e+00> : vector<128xf32>
    %13 = vector.multi_reduction <add>, %12, %cst_7 [1] : vector<128x128xf32> to vector<128xf32>
    %14 = vector.shape_cast %13 : vector<128xf32> to vector<128x1xf32>
    %cst_8 = arith.constant 1.280000e+02 : f32
    %15 = vector.broadcast %cst_8 : f32 to vector<128x1xf32>
    %16 = arith.divf %14, %15 : vector<128x1xf32>
    %cst_9 = arith.constant 9.99999974E-6 : f32
    %17 = vector.broadcast %cst_9 : f32 to vector<128x1xf32>
    %18 = arith.addf %16, %17 : vector<128x1xf32>
    %19 = math.rsqrt %18 : vector<128x1xf32>
    %20 = vector.broadcast %19 : vector<128x1xf32> to vector<128x128xf32>
    %21 = arith.mulf %11, %20 : vector<128x128xf32>
    %c0_10 = arith.constant 0 : index
    %c0_11 = arith.constant 0 : index
    %22 = vector.load %arg3[%c0_10, %c0_11] : memref<1x128xf32, #tpu.memory_space<vmem>>, vector<1x128xf32>
    %23 = vector.broadcast %22 : vector<1x128xf32> to vector<128x128xf32>
    %24 = arith.mulf %21, %23 : vector<128x128xf32>
    %c0_12 = arith.constant 0 : index
    %c0_13 = arith.constant 0 : index
    %25 = vector.load %arg4[%c0_12, %c0_13] : memref<1x128xf32, #tpu.memory_space<vmem>>, vector<1x128xf32>
    %26 = vector.broadcast %25 : vector<1x128xf32> to vector<128x128xf32>
    %27 = arith.addf %24, %26 : vector<128x128xf32>
    %cst_14 = arith.constant 0.000000e+00 : f32
    %28 = vector.broadcast %cst_14 : f32 to vector<128x128xf32>
    %29 = arith.maximumf %27, %28 : vector<128x128xf32>
    %c0_15 = arith.constant 0 : index
    %c0_16 = arith.constant 0 : index
    %30 = vector.load %arg5[%c0_15, %c0_16] : memref<128x128xf32, #tpu.memory_space<vmem>>, vector<128x128xf32>
    %cst_17 = arith.constant dense<0.000000e+00> : vector<128x128xf32>
    %31 = tpu.matmul %30, %29, %cst_17 {dimension_numbers = #tpu.dot_dimension_numbers<[1], [0], [0], [1], [0, 0, 1, 1], [], []>} : vector<128x128xf32>, vector<128x128xf32>, vector<128x128xf32> -> vector<128x128xf32>
    %c0_18 = arith.constant 0 : index
    %c0_19 = arith.constant 0 : index
    %32 = vector.load %arg5[%c0_18, %c0_19] : memref<128x128xf32, #tpu.memory_space<vmem>>, vector<128x128xf32>
    %cst_20 = arith.constant dense<0.000000e+00> : vector<128x128xf32>
    %33 = tpu.matmul %32, %31, %cst_20 {dimension_numbers = #tpu.dot_dimension_numbers<[1], [0], [0], [1], [0, 0, 1, 1], [], []>} : vector<128x128xf32>, vector<128x128xf32>, vector<128x128xf32> -> vector<128x128xf32>
    %c0_21 = arith.constant 0 : index
    %c0_22 = arith.constant 0 : index
    %34 = vector.load %arg6[%c0_21, %c0_22] : memref<128x128xf32, #tpu.memory_space<vmem>>, vector<128x128xf32>
    tpu.vector_store %arg6[%c0_21, %c0_22], %33 {strides = array<i32>} : memref<128x128xf32, #tpu.memory_space<vmem>>, vector<128x128xf32>,
    return
  }
}

</mosaic_0001>

<bundles_post_ra>
// kernel: sparse_ngcn_forward.1
= control target key start
LH: loop header
LB: loop body
LE: loop exit
PB: predicated region body
PF: predicated region fallthrough
CT: control target
= control target key end

     0   :  { %11 = vsyncpa [#allocation3], 0  ;;  %s1650_s0 = inlined_call_operand.vmem [shape: f32[128,64], index: 0, kind: input, shape index: {}]   ;;  %s1651_s1 = inlined_call_operand.vmem [shape: f32[64,128], index: 1, kind: input, shape index: {}]   ;;  %s1652_s2 = inlined_call_operand.vmem [shape: f32[1,128], index: 2, kind: input, shape index: {}]   ;;  %s1653_s3 = inlined_call_operand.vmem [shape: f32[1,128], index: 3, kind: input, shape index: {}]   ;;  %s1654_s4 = inlined_call_operand.vmem [shape: f32[1,128], index: 4, kind: input, shape index: {}]   ;;  %s1655_s5 = inlined_call_operand.hbm [shape: f32[128,128], index: 5, kind: input, shape index: {}]   ;;  %s1656_s6 = inlined_call_operand.hbm [shape: f32[128,128], index: 6, kind: output, shape index: {}]  }
   0x1   :  { %12 = vsyncpa [#allocation4], 0  ;;  %s1280_s21 = smov [#allocation2]   ;;  %s1232_s25 = scalar_lea.hbm %s1655_s5, 2048 }
   0x2   :  { %s28_s22 = sshll.u32 %s1280_s21, 4  ;;  %p1233_p0 = scmp.ne.s32.totalorder %s1655_s5, %s1232_s25  ;;  %s29_s22 = int_to_ptr.vmem [resolvable:$true] %s28_s22 }
   0x3   :  { %p1236_p1 = scmp.lt.u32.totalorder %s1232_s25, %s1655_s5 }
   0x5   :  { %p1238_p2 = pnand %p1236_p1, %p1233_p0 }
   0x7   :  { %1241 = shalt.err (!%p1238_p2)
}
   0x8   :  { %s1242_s30 = scalar_lea.vmem %s29_s22, 2048  ;;  %p1247_p4 = scmp.lt.s32.totalorder %s29_s22, %s29_s22 }
   0x9   :  { %p1243_p3 = scmp.ne.s32.totalorder %s29_s22, %s1242_s30  ;;  %p1248_p5 = scmp.lt.s32.totalorder %s1242_s30, %s1242_s30 }
   0xb   :  { %p1249_p6 = por %p1248_p5, %p1247_p4 }
   0xd   :  { %p1250_p7 = pnand %p1249_p6, %p1243_p3 }
   0xf   :  { %1253 = shalt.err (!%p1250_p7)
}
  0x10   :  { %s1281_s7 = smov 128   ;;  %s1282_s8 = smov 8  }
  0x11   :  { %34 = dma.hbm_to_vmem [thread:$0]  %s1655_s5, 2048, %s29_s22, [#allocation3], %s1281_s7, %s1281_s7, %s1282_s8  }
  0x12   :  { %1276 = dma.done.wait [#allocation3], 2048  }
  0x13   :  { %1277 = vsyncadd [#allocation3], 4294965248  ;;  %v54_v0 = vld [vmem:[%s1651_s1] sm:$0xff]  ;;  %v55_v1 = vld [vmem:[%s1651_s1 + $0x8] sm:$0xff]  ;;  %vm69_vm0 = vcmask 523264  }
  0x14   :  { %v56_v2 = vld [vmem:[%s1651_s1 + $0x10] sm:$0xff]  ;;  %v1100_v3 = vpack.c.bf16 %v55_v1, %v54_v0  ;;  %v57_v4 = vld [vmem:[%s1651_s1 + $0x18] sm:$0xff]  ;;  %v58_v6 = vld [vmem:[%s1651_s1 + $0x20] sm:$0xff] }
  0x15   :  { %v1104_v5 = vpack.c.bf16 %v57_v4, %v56_v2  ;;  %v59_v7 = vld [vmem:[%s1651_s1 + $0x28] sm:$0xff]  ;;  %v38_v8 = vld [vmem:[%s1650_s0] sm:$0xff]  ;;  %v60_v10 = vld [vmem:[%s1651_s1 + $0x30] sm:$0xff] }
  0x16   :  { %1101 = vmatprep.subr.bf16.mxu0 %v1100_v3  ;;  %964 = vmatprep.mubr.msk.f32.mxu0 %vm69_vm0, %v38_v8  ;;  %v1108_v9 = vpack.c.bf16 %v59_v7, %v58_v6  ;;  %v61_v11 = vld [vmem:[%s1651_s1 + $0x38] sm:$0xff]  ;;  %v39_v13 = vld [vmem:[%s1650_s0 + $0x8] sm:$0xff]  ;;  %v40_v14 = vld [vmem:[%s1650_s0 + $0x10] sm:$0xff] }
  0x17   :  { %1103 = vmatpush3.bf16.msra.mxu0 %v1100_v3  ;;  %v1112_v12 = vpack.c.bf16 %v61_v11, %v60_v10  ;;  %v41_v15 = vld [vmem:[%s1650_s0 + $0x18] sm:$0xff]  ;;  %v42_v16 = vld [vmem:[%s1650_s0 + $0x20] sm:$0xff]  ;;  %v43_v17 = vld [vmem:[%s1650_s0 + $0x28] sm:$0xff] }
  0x18   :  { %1105 = vmatprep.subr.bf16.mxu0 %v1104_v5  ;;  %v44_v18 = vld [vmem:[%s1650_s0 + $0x30] sm:$0xff]  ;;  %v45_v19 = vld [vmem:[%s1650_s0 + $0x38] sm:$0xff]  ;;  %v46_v20 = vld [vmem:[%s1650_s0 + $0x40] sm:$0xff] }
  0x19   :  { %v47_v21 = vld [vmem:[%s1650_s0 + $0x48] sm:$0xff]  ;;  %v48_v22 = vld [vmem:[%s1650_s0 + $0x50] sm:$0xff]  ;;  %v49_v23 = vld [vmem:[%s1650_s0 + $0x58] sm:$0xff] }
  0x1a   :  { %v50_v24 = vld [vmem:[%s1650_s0 + $0x60] sm:$0xff]  ;;  %v51_v25 = vld [vmem:[%s1650_s0 + $0x68] sm:$0xff]  ;;  %v52_v26 = vld [vmem:[%s1650_s0 + $0x70] sm:$0xff] }
  0x1b   :  { %1107 = vmatpush3.bf16.msra.mxu0 %v1104_v5  ;;  %v53_v27 = vld [vmem:[%s1650_s0 + $0x78] sm:$0xff]  ;;  %v841_v28 = vld [vmem:[%s1652_s2] ss:$0 sm:$0xff] }
  0x1c   :  { %1109 = vmatprep.subr.bf16.mxu0 %v1108_v9 }
  0x1f   :  { %1111 = vmatpush3.bf16.msra.mxu0 %v1108_v9 }
  0x20   :  { %1113 = vmatprep.subr.bf16.mxu0 %v1112_v12 }
  0x23   :  { %1115 = vmatpush3.bf16.msra.mxu0 %v1112_v12 }
  0x26   :  { %965 = vmatmul.mubr.msk.f32.vlgmr.msra.gmra.mrb[0].mxu0 %vm69_vm0, %v39_v13 }
  0x27   :  { %967 = vmatprep.mubr.msk.f32.mxu0 %vm69_vm0, %v40_v14 }
  0x2a   :  { %968 = vmatmul.mubr.msk.f32.gmra.mrb[2].mxu0 %vm69_vm0, %v41_v15 }
  0x2b   :  { %970 = vmatprep.mubr.msk.f32.mxu0 %vm69_vm0, %v42_v16 }
  0x2e   :  { %971 = vmatmul.mubr.msk.f32.gmra.mrb[4].mxu0 %vm69_vm0, %v43_v17 }
  0x2f   :  { %973 = vmatprep.mubr.msk.f32.mxu0 %vm69_vm0, %v44_v18 }
  0x32   :  { %974 = vmatmul.mubr.msk.f32.gmra.mrb[6].mxu0 %vm69_vm0, %v45_v19 }
  0x33   :  { %976 = vmatprep.mubr.msk.f32.mxu0 %vm69_vm0, %v46_v20 }
  0x36   :  { %977 = vmatmul.mubr.msk.f32.gmra.mrb[8].mxu0 %vm69_vm0, %v47_v21 }
  0x37   :  { %979 = vmatprep.mubr.msk.f32.mxu0 %vm69_vm0, %v48_v22 }
  0x3a   :  { %980 = vmatmul.mubr.msk.f32.gmra.mrb[10].mxu0 %vm69_vm0, %v49_v23 }
  0x3b   :  { %982 = vmatprep.mubr.msk.f32.mxu0 %vm69_vm0, %v50_v24 }
  0x3e   :  { %983 = vmatmul.mubr.msk.f32.gmra.mrb[12].mxu0 %vm69_vm0, %v51_v25 }
  0x3f   :  { %985 = vmatprep.mubr.msk.f32.mxu0 %vm69_vm0, %v52_v26 }
  0x42   :  { %986 = vmatmul.mubr.msk.f32.gmra.mrb[14].mxu0 %vm69_vm0, %v53_v27 }
  0xf9   :  { %v966_v29 = vpop.f32.mrb[0].mxu0 }
  0xfa   :  { %v184_v30 = vpop.f32.mrb[1].mxu0  ;;  %v190_v35 = vadd.f32 %v966_v29, %v841_v28 }
  0xfb   :  { %v185_v31 = vadd.f32 %v841_v28, %v184_v30 }
  0xfd   :  { %v969_v32 = vpop.f32.mrb[2].mxu0  ;;  %263 = vadd.xlane.f32.xlu0 %v185_v31 }
  0xfe   :  { %v200_v33 = vadd.f32 %v969_v32, %v841_v28  ;;  %v194_v34 = vpop.f32.mrb[3].mxu0 }
  0xff   :  { %v195_v37 = vadd.f32 %v841_v28, %v194_v34 }
 0x100   :  { %269 = vadd.xlane.f32.xlu1 %v200_v33 }
 0x101   :  { %v972_v36 = vpop.f32.mrb[4].mxu0  ;;  %265 = vadd.xlane.f32.xlu0 %v190_v35 }
 0x102   :  { %v204_v38 = vpop.f32.mrb[5].mxu0  ;;  %v210_v40 = vadd.f32 %v972_v36, %v841_v28 }
 0x103   :  { %v205_v39 = vadd.f32 %v841_v28, %v204_v38 }
 0x104   :  { %267 = vadd.xlane.f32.xlu1 %v195_v37 }
 0x105   :  { %v975_v41 = vpop.f32.mrb[6].mxu0  ;;  %271 = vadd.xlane.f32.xlu0 %v205_v39 }
 0x106   :  { %v214_v42 = vpop.f32.mrb[7].mxu0  ;;  %v1425_v44 = vadd.f32 %v975_v41, %v841_v28 }
 0x107   :  { %v215_v43 = vadd.f32 %v841_v28, %v214_v42 }
 0x108   :  { %273 = vadd.xlane.f32.xlu1 %v210_v40 }
 0x109   :  { %v978_v45 = vpop.f32.mrb[8].mxu0  ;;  %275 = vadd.xlane.f32.xlu0 %v215_v43 }
 0x10a   :  { %v224_v46 = vpop.f32.mrb[9].mxu0  ;;  %v1427_v48 = vadd.f32 %v978_v45, %v841_v28 }
 0x10b   :  { %v225_v47 = vadd.f32 %v841_v28, %v224_v46 }
 0x10c   :  { %277 = vadd.xlane.f32.xlu1 %v1425_v44 }
 0x10d   :  { %v981_v49 = vpop.f32.mrb[10].mxu0  ;;  %279 = vadd.xlane.f32.xlu0 %v225_v47 }
 0x10e   :  { %v234_v50 = vpop.f32.mrb[11].mxu0  ;;  %v1432_v52 = vadd.f32 %v981_v49, %v841_v28 }
 0x10f   :  { %v1430_v51 = vadd.f32 %v841_v28, %v234_v50 }
 0x110   :  { %281 = vadd.xlane.f32.xlu1 %v1427_v48 }
 0x111   :  { %v984_v53 = vpop.f32.mrb[12].mxu0  ;;  %283 = vadd.xlane.f32.xlu0 %v1430_v51 }
 0x112   :  { %v244_v54 = vpop.f32.mrb[13].mxu0  ;;  %v1438_v56 = vadd.f32 %v984_v53, %v841_v28 }
 0x113   :  { %v1436_v55 = vadd.f32 %v841_v28, %v244_v54 }
 0x114   :  { %285 = vadd.xlane.f32.xlu1 %v1432_v52 }
 0x115   :  { %v987_v57 = vpop.f32.mrb[14].mxu0  ;;  %287 = vadd.xlane.f32.xlu0 %v1436_v55 }
 0x116   :  { %v254_v58 = vpop.f32.mrb[15].mxu0  ;;  %v1444_v60 = vadd.f32 %v987_v57, %v841_v28 }
 0x117   :  { %v1442_v59 = vadd.f32 %v841_v28, %v254_v58 }
 0x118   :  { %289 = vadd.xlane.f32.xlu1 %v1438_v56 }
 0x119   :  { %291 = vadd.xlane.f32.xlu0 %v1442_v59 }
 0x11c   :  { %293 = vadd.xlane.f32.xlu1 %v1444_v60 }
 0x18a   :  { %v264_v61 = vpop.xlane.xlu0 %263 }
 0x18b   :  { %v296_v62 = vmul.f32 0.0078125, %v264_v61 }
 0x18d   :  { %v1449_v63 = vsub.f32 %v185_v31, %v296_v62  ;;  %v270_v0 = vpop.xlane.xlu1 %269 }
 0x18e   :  { %v266_v1 = vpop.xlane.xlu0 %265  ;;  %v299_v2 = vmul.f32 0.0078125, %v270_v0 }
 0x18f   :  { %v297_v3 = vmul.f32 0.0078125, %v266_v1  ;;  %v328_v4 = vmul.f32 %v1449_v63, %v1449_v63 }
 0x190   :  { %v1455_v9 = vsub.f32 %v200_v33, %v299_v2 }
 0x191   :  { %v1453_v5 = vsub.f32 %v190_v35, %v297_v3  ;;  %v268_v6 = vpop.xlane.xlu1 %267  ;;  %344 = vadd.xlane.f32.xlu0 %v328_v4 }
 0x192   :  { %v298_v7 = vmul.f32 0.0078125, %v268_v6  ;;  %v272_v8 = vpop.xlane.xlu0 %271  ;;  %v331_v19 = vmul.f32 %v1455_v9, %v1455_v9 }
 0x193   :  { %v300_v10 = vmul.f32 0.0078125, %v272_v8  ;;  %v329_v11 = vmul.f32 %v1453_v5, %v1453_v5 }
 0x194   :  { %v1459_v12 = vsub.f32 %v195_v37, %v298_v7 }
 0x195   :  { %v274_v13 = vpop.xlane.xlu1 %273  ;;  %346 = vadd.xlane.f32.xlu1 %v329_v11  ;;  %v1461_v14 = vsub.f32 %v205_v39, %v300_v10 }
 0x196   :  { %v301_v15 = vmul.f32 0.0078125, %v274_v13  ;;  %v276_v16 = vpop.xlane.xlu0 %275  ;;  %v330_v17 = vmul.f32 %v1459_v12, %v1459_v12 }
 0x197   :  { %v302_v18 = vmul.f32 0.0078125, %v276_v16  ;;  %v332_v25 = vmul.f32 %v1461_v14, %v1461_v14 }
 0x198   :  { %v1467_v20 = vsub.f32 %v210_v40, %v301_v15  ;;  %348 = vadd.xlane.f32.xlu0 %v330_v17 }
 0x199   :  { %v278_v21 = vpop.xlane.xlu1 %277  ;;  %350 = vadd.xlane.f32.xlu1 %v331_v19  ;;  %v1469_v22 = vsub.f32 %v215_v43, %v302_v18 }
 0x19a   :  { %v303_v23 = vmul.f32 0.0078125, %v278_v21  ;;  %v280_v24 = vpop.xlane.xlu0 %279  ;;  %v333_v26 = vmul.f32 %v1467_v20, %v1467_v20 }
 0x19b   :  { %v304_v27 = vmul.f32 0.0078125, %v280_v24  ;;  %v334_v33 = vmul.f32 %v1469_v22, %v1469_v22 }
 0x19c   :  { %v1476_v28 = vsub.f32 %v1425_v44, %v303_v23  ;;  %352 = vadd.xlane.f32.xlu0 %v332_v25  ;;  %v1524_v25 = vld [vmem:[%s1653_s3] ss:$0 sm:$0xff]  ;;  %s1283_s3 = smov [#allocation5]  }
 0x19d   :  { %v282_v29 = vpop.xlane.xlu1 %281  ;;  %354 = vadd.xlane.f32.xlu1 %v333_v26  ;;  %v1478_v30 = vsub.f32 %v225_v47, %v304_v27 }
 0x19e   :  { %v305_v31 = vmul.f32 0.0078125, %v282_v29  ;;  %v284_v32 = vpop.xlane.xlu0 %283  ;;  %v335_v34 = vmul.f32 %v1476_v28, %v1476_v28 }
 0x19f   :  { %v306_v35 = vmul.f32 0.0078125, %v284_v32  ;;  %v336_v41 = vmul.f32 %v1478_v30, %v1478_v30 }
 0x1a0   :  { %v1485_v36 = vsub.f32 %v1427_v48, %v305_v31  ;;  %356 = vadd.xlane.f32.xlu0 %v334_v33 }
 0x1a1   :  { %v286_v37 = vpop.xlane.xlu1 %285  ;;  %358 = vadd.xlane.f32.xlu1 %v335_v34  ;;  %v1488_v38 = vsub.f32 %v1430_v51, %v306_v35 }
 0x1a2   :  { %v307_v39 = vmul.f32 0.0078125, %v286_v37  ;;  %v288_v40 = vpop.xlane.xlu0 %287  ;;  %v337_v42 = vmul.f32 %v1485_v36, %v1485_v36 }
 0x1a3   :  { %v308_v43 = vmul.f32 0.0078125, %v288_v40  ;;  %v338_v49 = vmul.f32 %v1488_v38, %v1488_v38 }
 0x1a4   :  { %v1495_v44 = vsub.f32 %v1432_v52, %v307_v39  ;;  %360 = vadd.xlane.f32.xlu0 %v336_v41  ;;  %v1531_v39 = vld [vmem:[%s1654_s4] ss:$0 sm:$0xff]  ;;  %s829_s4 = sshll.u32 %s1283_s3, 4  ;;  %s830_s4 = int_to_ptr.vmem [resolvable:$true] %s829_s4 }
 0x1a5   :  { %v290_v45 = vpop.xlane.xlu1 %289  ;;  %362 = vadd.xlane.f32.xlu1 %v337_v42  ;;  %v1498_v46 = vsub.f32 %v1436_v55, %v308_v43  ;;  %s1254_s15 = scalar_lea.vmem %s830_s4, 2048  ;;  %p1259_p9 = scmp.lt.s32.totalorder %s830_s4, %s830_s4 }
 0x1a6   :  { %v309_v47 = vmul.f32 0.0078125, %v290_v45  ;;  %v292_v48 = vpop.xlane.xlu0 %291  ;;  %v339_v50 = vmul.f32 %v1495_v44, %v1495_v44  ;;  %p1255_p8 = scmp.ne.s32.totalorder %s830_s4, %s1254_s15  ;;  %p1260_p10 = scmp.lt.s32.totalorder %s1254_s15, %s1254_s15 }
 0x1a7   :  { %v310_v51 = vmul.f32 0.0078125, %v292_v48  ;;  %v340_v57 = vmul.f32 %v1498_v46, %v1498_v46 }
 0x1a8   :  { %v1505_v53 = vsub.f32 %v1438_v56, %v309_v47  ;;  %364 = vadd.xlane.f32.xlu0 %v338_v49  ;;  %p1261_p11 = por %p1260_p10, %p1259_p9 }
 0x1a9   :  { %v294_v52 = vpop.xlane.xlu1 %293  ;;  %366 = vadd.xlane.f32.xlu1 %v339_v50  ;;  %v1508_v54 = vsub.f32 %v1442_v59, %v310_v51  ;;  %v502_v59 = vld [vmem:[#allocation2] sm:$0xff] }
 0x1aa   :  { %v311_v55 = vmul.f32 0.0078125, %v294_v52  ;;  %v341_v58 = vmul.f32 %v1505_v53, %v1505_v53  ;;  %1020 = vmatprep.mubr.f32.mxu1 %v502_v59  ;;  %1076 = vmatprep.mubr.f32.mxu0 %v502_v59  ;;  %p1262_p12 = pnand %p1261_p11, %p1255_p8 }
 0x1ab   :  { %v342_v56 = vmul.f32 %v1508_v54, %v1508_v54 }
 0x1ac   :  { %v1515_v61 = vsub.f32 %v1444_v60, %v311_v55  ;;  %368 = vadd.xlane.f32.xlu0 %v340_v57 }
 0x1ad   :  { %370 = vadd.xlane.f32.xlu1 %v341_v58 }
 0x1ae   :  { %v343_v62 = vmul.f32 %v1515_v61, %v1515_v61 }
 0x1b0   :  { %372 = vadd.xlane.f32.xlu0 %v342_v56 }
 0x1b1   :  { %374 = vadd.xlane.f32.xlu1 %v343_v62 }
 0x21e   :  { %v345_v0 = vpop.xlane.xlu0 %344 }
 0x21f   :  { %v376_v1 = vmul.f32 0.0078125, %v345_v0 }
 0x221   :  { %v392_v2 = vadd.f32 1e-05, %v376_v1 }
 0x222   :  { %v347_v3 = vpop.xlane.xlu1 %346 }
 0x223   :  { %1200 = vrsqrt.f32 %v392_v2  ;;  %v377_v60 = vmul.f32 0.0078125, %v347_v3 }
 0x225   :  { %v393_v4 = vadd.f32 1e-05, %v377_v60  ;;  %v349_v6 = vpop.xlane.xlu0 %348 }
 0x226   :  { %v378_v7 = vmul.f32 0.0078125, %v349_v6  ;;  %v351_v8 = vpop.xlane.xlu1 %350 }
 0x227   :  { %1202 = vrsqrt.f32 %v393_v4  ;;  %v379_v10 = vmul.f32 0.0078125, %v351_v8 }
 0x228   :  { %v394_v11 = vadd.f32 1e-05, %v378_v7 }
 0x229   :  { %v395_v13 = vadd.f32 1e-05, %v379_v10  ;;  %v353_v15 = vpop.xlane.xlu0 %352 }
 0x22a   :  { %1204 = vrsqrt.f32 %v394_v11  ;;  %v380_v16 = vmul.f32 0.0078125, %v353_v15  ;;  %v355_v17 = vpop.xlane.xlu1 %354 }
 0x22b   :  { %1206 = vrsqrt.f32 %v395_v13  ;;  %v381_v18 = vmul.f32 0.0078125, %v355_v17 }
 0x22c   :  { %v396_v19 = vadd.f32 1e-05, %v380_v16 }
 0x22d   :  { %v1201_v21 = vpop.eup %1200  ;;  %v397_v23 = vadd.f32 1e-05, %v381_v18  ;;  %v357_v24 = vpop.xlane.xlu0 %356 }
 0x22e   :  { %1208 = vrsqrt.f32 %v396_v19  ;;  %v382_v26 = vmul.f32 0.0078125, %v357_v24  ;;  %v359_v27 = vpop.xlane.xlu1 %358  ;;  %v424_v29 = vmul.f32 %v1201_v21, %v1449_v63 }
 0x22f   :  { %1210 = vrsqrt.f32 %v397_v23  ;;  %v383_v31 = vmul.f32 0.0078125, %v359_v27 }
 0x230   :  { %v398_v32 = vadd.f32 1e-05, %v382_v26  ;;  %v447_v33 = vmul.f32 %v1524_v25, %v424_v29 }
 0x231   :  { %v1203_v34 = vpop.eup %1202  ;;  %v399_v35 = vadd.f32 1e-05, %v383_v31  ;;  %v361_v37 = vpop.xlane.xlu0 %360 }
 0x232   :  { %1212 = vrsqrt.f32 %v398_v32  ;;  %v384_v40 = vmul.f32 0.0078125, %v361_v37  ;;  %v363_v41 = vpop.xlane.xlu1 %362  ;;  %v425_v42 = vmul.f32 %v1203_v34, %v1453_v5  ;;  %v470_v48 = vadd.f32 %v1531_v39, %v447_v33 }
 0x233   :  { %1214 = vrsqrt.f32 %v399_v35  ;;  %v385_v63 = vmul.f32 0.0078125, %v363_v41 }
 0x234   :  { %v1205_v43 = vpop.eup %1204  ;;  %v400_v45 = vadd.f32 1e-05, %v384_v40  ;;  %v448_v47 = vmul.f32 %v1524_v25, %v425_v42  ;;  %v486_v1 = vmax.f32 %v470_v48, 0.0 }
 0x235   :  { %v1207_v49 = vpop.eup %1206  ;;  %v401_v50 = vadd.f32 1e-05, %v385_v63  ;;  %v365_v51 = vpop.xlane.xlu0 %364  ;;  %v426_v52 = vmul.f32 %v1205_v43, %v1459_v12 }
 0x236   :  { %1216 = vrsqrt.f32 %v400_v45  ;;  %v386_v55 = vmul.f32 0.0078125, %v365_v51  ;;  %v367_v57 = vpop.xlane.xlu1 %366  ;;  %v471_v58 = vadd.f32 %v1531_v39, %v448_v47  ;;  %v427_v5 = vmul.f32 %v1207_v49, %v1455_v9 }
 0x237   :  { %1218 = vrsqrt.f32 %v401_v50  ;;  %v387_v56 = vmul.f32 0.0078125, %v367_v57  ;;  %v449_v62 = vmul.f32 %v1524_v25, %v426_v52 }
 0x238   :  { %v1209_v59 = vpop.eup %1208  ;;  %v402_v0 = vadd.f32 1e-05, %v386_v55  ;;  %v487_v2 = vmax.f32 %v471_v58, 0.0  ;;  %v450_v3 = vmul.f32 %v1524_v25, %v427_v5 }
 0x239   :  { %v1211_v60 = vpop.eup %1210  ;;  %v403_v4 = vadd.f32 1e-05, %v387_v56  ;;  %v369_v12 = vpop.xlane.xlu0 %368  ;;  %v472_v6 = vadd.f32 %v1531_v39, %v449_v62  ;;  %v428_v7 = vmul.f32 %v1209_v59, %v1461_v14 }
 0x23a   :  { %1220 = vrsqrt.f32 %v402_v0  ;;  %v388_v8 = vmul.f32 0.0078125, %v369_v12  ;;  %v371_v9 = vpop.xlane.xlu1 %370  ;;  %v1116_v10 = vpack.c.bf16 %v487_v2, %v486_v1  ;;  %v473_v11 = vadd.f32 %v1531_v39, %v450_v3 }
 0x23b   :  { %1222 = vrsqrt.f32 %v403_v4  ;;  %v389_v13 = vmul.f32 0.0078125, %v371_v9  ;;  %v488_v15 = vmax.f32 %v472_v6, 0.0  ;;  %v429_v16 = vmul.f32 %v1211_v60, %v1467_v20 }
 0x23c   :  { %v1213_v17 = vpop.eup %1212  ;;  %v404_v18 = vadd.f32 1e-05, %v388_v8  ;;  %1117 = vmatprep.subr.bf16.mxu1 %v1116_v10  ;;  %v489_v19 = vmax.f32 %v473_v11, 0.0  ;;  %v451_v21 = vmul.f32 %v1524_v25, %v428_v7 }
 0x23d   :  { %v1215_v23 = vpop.eup %1214  ;;  %v405_v24 = vadd.f32 1e-05, %v389_v13  ;;  %1119 = vmatpush3.bf16.msra.mxu1 %v1116_v10  ;;  %v373_v14 = vpop.xlane.xlu0 %372  ;;  %v452_v26 = vmul.f32 %v1524_v25, %v429_v16  ;;  %v430_v27 = vmul.f32 %v1213_v17, %v1469_v22 }
 0x23e   :  { %1224 = vrsqrt.f32 %v404_v18  ;;  %v390_v29 = vmul.f32 0.0078125, %v373_v14  ;;  %v375_v31 = vpop.xlane.xlu1 %374  ;;  %v1120_v32 = vpack.c.bf16 %v489_v19, %v488_v15  ;;  %v474_v20 = vadd.f32 %v1531_v39, %v451_v21 }
 0x23f   :  { %1226 = vrsqrt.f32 %v405_v24  ;;  %v391_v33 = vmul.f32 0.0078125, %v375_v31  ;;  %v475_v34 = vadd.f32 %v1531_v39, %v452_v26  ;;  %v431_v35 = vmul.f32 %v1215_v23, %v1476_v28 }
 0x240   :  { %v1217_v37 = vpop.eup %1216  ;;  %v406_v40 = vadd.f32 1e-05, %v390_v29  ;;  %1121 = vmatprep.subr.bf16.mxu1 %v1120_v32  ;;  %v490_v41 = vmax.f32 %v474_v20, 0.0  ;;  %v453_v42 = vmul.f32 %v1524_v25, %v430_v27  ;;  %v1587_v20 = vld [vmem:[#allocation2 + $0x20] sm:$0xff] }
 0x241   :  { %v1219_v63 = vpop.eup %1218  ;;  %v407_v22 = vadd.f32 1e-05, %v391_v33  ;;  %1123 = vmatpush3.bf16.msra.mxu1 %v1120_v32  ;;  %v491_v43 = vmax.f32 %v475_v34, 0.0  ;;  %v454_v45 = vmul.f32 %v1524_v25, %v431_v35  ;;  %v432_v47 = vmul.f32 %v1217_v37, %v1478_v30  ;;  %v1581_v32 = vld [vmem:[#allocation2 + $0x10] sm:$0xff]  ;;  %v1597_v34 = vld [vmem:[#allocation2 + $0x38] sm:$0xff]  ;;  %v1599_v35 = vld [vmem:[#allocation2 + $0x40] sm:$0xff] }
 0x242   :  { %1228 = vrsqrt.f32 %v406_v40  ;;  %v476_v48 = vadd.f32 %v1531_v39, %v453_v42  ;;  %v433_v49 = vmul.f32 %v1219_v63, %v1485_v36  ;;  %v1593_v33 = vld [vmem:[#allocation2 + $0x30] sm:$0xff]  ;;  %v1603_v37 = vld [vmem:[#allocation2 + $0x48] sm:$0xff]  ;;  %v514_v42 = vld [vmem:[#allocation2 + $0x60] sm:$0xff] }
 0x243   :  { %1230 = vrsqrt.f32 %v407_v22  ;;  %v1124_v28 = vpack.c.bf16 %v491_v43, %v490_v41  ;;  %v477_v50 = vadd.f32 %v1531_v39, %v454_v45  ;;  %v455_v51 = vmul.f32 %v1524_v25, %v432_v47  ;;  %v1605_v40 = vld [vmem:[#allocation2 + $0x50] sm:$0xff]  ;;  %v1609_v41 = vld [vmem:[#allocation2 + $0x58] sm:$0xff]  ;;  %v1612_v63 = vld [vmem:[#allocation2 + $0x68] sm:$0xff] }
 0x244   :  { %v1221_v52 = vpop.eup %1220  ;;  %v492_v55 = vmax.f32 %v476_v48, 0.0  ;;  %v456_v57 = vmul.f32 %v1524_v25, %v433_v49  ;;  %v1614_v22 = vld [vmem:[#allocation2 + $0x70] sm:$0xff]  ;;  %v1618_v43 = vld [vmem:[#allocation2 + $0x78] sm:$0xff] }
 0x245   :  { %v1223_v58 = vpop.eup %1222  ;;  %1125 = vmatprep.subr.bf16.mxu1 %v1124_v28  ;;  %v493_v5 = vmax.f32 %v477_v50, 0.0  ;;  %v478_v30 = vadd.f32 %v1531_v39, %v455_v51  ;;  %v434_v56 = vmul.f32 %v1221_v52, %v1488_v38 }
 0x246   :  { %1127 = vmatpush3.bf16.msra.mxu1 %v1124_v28  ;;  %v479_v36 = vadd.f32 %v1531_v39, %v456_v57  ;;  %v435_v62 = vmul.f32 %v1223_v58, %v1495_v44 }
 0x247   :  { %v1128_v59 = vpack.c.bf16 %v493_v5, %v492_v55  ;;  %v494_v0 = vmax.f32 %v478_v30, 0.0  ;;  %v457_v1 = vmul.f32 %v1524_v25, %v434_v56 }
 0x248   :  { %v1225_v2 = vpop.eup %1224  ;;  %v495_v3 = vmax.f32 %v479_v36, 0.0  ;;  %v458_v60 = vmul.f32 %v1524_v25, %v435_v62 }
 0x249   :  { %v1227_v4 = vpop.eup %1226  ;;  %1129 = vmatprep.subr.bf16.mxu1 %v1128_v59  ;;  %v480_v12 = vadd.f32 %v1531_v39, %v457_v1  ;;  %v436_v6 = vmul.f32 %v1225_v2, %v1498_v46 }
 0x24a   :  { %1131 = vmatpush3.bf16.msra.mxu1 %v1128_v59  ;;  %v1132_v38 = vpack.c.bf16 %v495_v3, %v494_v0  ;;  %v481_v7 = vadd.f32 %v1531_v39, %v458_v60  ;;  %v437_v44 = vmul.f32 %v1227_v4, %v1505_v53 }
 0x24b   :  { %v496_v8 = vmax.f32 %v480_v12, 0.0  ;;  %v459_v9 = vmul.f32 %v1524_v25, %v436_v6 }
 0x24c   :  { %v1229_v10 = vpop.eup %1228  ;;  %1133 = vmatprep.subr.bf16.mxu1 %v1132_v38  ;;  %v497_v11 = vmax.f32 %v481_v7, 0.0  ;;  %v460_v13 = vmul.f32 %v1524_v25, %v437_v44 }
 0x24d   :  { %v1231_v15 = vpop.eup %1230  ;;  %v482_v16 = vadd.f32 %v1531_v39, %v459_v9  ;;  %v438_v17 = vmul.f32 %v1229_v10, %v1508_v54 }
 0x24e   :  { %1135 = vmatpush3.bf16.msra.mxu1 %v1132_v38  ;;  %v1136_v46 = vpack.c.bf16 %v497_v11, %v496_v8  ;;  %v483_v18 = vadd.f32 %v1531_v39, %v460_v13  ;;  %v439_v19 = vmul.f32 %v1231_v15, %v1515_v61  ;;  %v1579_v61 = vld [vmem:[#allocation2 + $0x8] sm:$0xff] }
 0x24f   :  { %v498_v53 = vmax.f32 %v482_v16, 0.0  ;;  %v461_v21 = vmul.f32 %v1524_v25, %v438_v17 }
 0x250   :  { %1137 = vmatprep.subr.bf16.mxu1 %v1136_v46  ;;  %v499_v23 = vmax.f32 %v483_v18, 0.0  ;;  %v462_v24 = vmul.f32 %v1524_v25, %v439_v19  ;;  %v1585_v25 = vld [vmem:[#allocation2 + $0x18] sm:$0xff] }
 0x251   :  { %v484_v14 = vadd.f32 %v1531_v39, %v461_v21 }
 0x252   :  { %1139 = vmatpush3.bf16.msra.mxu1 %v1136_v46  ;;  %v1140_v26 = vpack.c.bf16 %v499_v23, %v498_v53  ;;  %v485_v27 = vadd.f32 %v1531_v39, %v462_v24  ;;  %v1591_v39 = vld [vmem:[#allocation2 + $0x28] sm:$0xff] }
 0x253   :  { %v500_v54 = vmax.f32 %v484_v14, 0.0 }
 0x254   :  { %1141 = vmatprep.subr.bf16.mxu1 %v1140_v26  ;;  %v501_v29 = vmax.f32 %v485_v27, 0.0 }
 0x256   :  { %1143 = vmatpush3.bf16.msra.mxu1 %v1140_v26  ;;  %v1144_v31 = vpack.c.bf16 %v501_v29, %v500_v54 }
 0x258   :  { %1145 = vmatprep.subr.bf16.mxu1 %v1144_v31 }
 0x25a   :  { %1147 = vmatpush3.bf16.msra.mxu1 %v1144_v31 }
 0x25d   :  { %1021 = vmatmul.mubr.f32.vlgmr.msra.gmra.mrb[0].mxu1 %v1579_v61 }
 0x25e   :  { %1023 = vmatprep.mubr.f32.mxu1 %v1581_v32 }
 0x261   :  { %1024 = vmatmul.mubr.f32.gmra.mrb[2].mxu1 %v1585_v25 }
 0x262   :  { %1026 = vmatprep.mubr.f32.mxu1 %v1587_v20 }
 0x265   :  { %1027 = vmatmul.mubr.f32.gmra.mrb[4].mxu1 %v1591_v39 }
 0x266   :  { %1029 = vmatprep.mubr.f32.mxu1 %v1593_v33 }
 0x269   :  { %1030 = vmatmul.mubr.f32.gmra.mrb[6].mxu1 %v1597_v34 }
 0x26a   :  { %1032 = vmatprep.mubr.f32.mxu1 %v1599_v35 }
 0x26d   :  { %1033 = vmatmul.mubr.f32.gmra.mrb[8].mxu1 %v1603_v37 }
 0x26e   :  { %1035 = vmatprep.mubr.f32.mxu1 %v1605_v40 }
 0x271   :  { %1036 = vmatmul.mubr.f32.gmra.mrb[10].mxu1 %v1609_v41 }
 0x272   :  { %1038 = vmatprep.mubr.f32.mxu1 %v514_v42 }
 0x275   :  { %1039 = vmatmul.mubr.f32.gmra.mrb[12].mxu1 %v1612_v63 }
 0x276   :  { %1041 = vmatprep.mubr.f32.mxu1 %v1614_v22 }
 0x279   :  { %1042 = vmatmul.mubr.f32.gmra.mrb[14].mxu1 %v1618_v43 }
 0x27a   :  { %1094 = vmatprep.mubr.f32.mxu1 %v514_v42 }
 0x330   :  { %v1022_v45 = vpop.f32.mrb[0].mxu1 }
 0x331   :  { %v584_v47 = vpop.f32.mrb[1].mxu1 }
 0x332   :  { %v1148_v48 = vpack.c.bf16 %v1022_v45, %v584_v47 }
 0x334   :  { %v1025_v49 = vpop.f32.mrb[2].mxu1  ;;  %1149 = vmatprep.subr.bf16.mxu0 %v1148_v48  ;;  %1180 = vmatprep.subr.bf16.mxu1 %v1148_v48 }
 0x335   :  { %v594_v28 = vpop.f32.mrb[3].mxu1  ;;  %1151 = vmatpush3.bf16.msra.mxu0 %v1148_v48  ;;  %1188 = vmatpush3.bf16.msra.mxu1 %v1148_v48 }
 0x336   :  { %v1152_v50 = vpack.c.bf16 %v1025_v49, %v594_v28 }
 0x338   :  { %v1028_v51 = vpop.f32.mrb[4].mxu1  ;;  %1153 = vmatprep.subr.bf16.mxu0 %v1152_v50  ;;  %1181 = vmatprep.subr.bf16.mxu1 %v1152_v50 }
 0x339   :  { %v604_v52 = vpop.f32.mrb[5].mxu1  ;;  %1155 = vmatpush3.bf16.msra.mxu0 %v1152_v50  ;;  %1189 = vmatpush3.bf16.msra.mxu1 %v1152_v50 }
 0x33a   :  { %v1156_v55 = vpack.c.bf16 %v1028_v51, %v604_v52 }
 0x33c   :  { %v1031_v57 = vpop.f32.mrb[6].mxu1  ;;  %1157 = vmatprep.subr.bf16.mxu0 %v1156_v55  ;;  %1182 = vmatprep.subr.bf16.mxu1 %v1156_v55 }
 0x33d   :  { %v614_v58 = vpop.f32.mrb[7].mxu1  ;;  %1159 = vmatpush3.bf16.msra.mxu0 %v1156_v55  ;;  %1190 = vmatpush3.bf16.msra.mxu1 %v1156_v55 }
 0x33e   :  { %v1160_v5 = vpack.c.bf16 %v1031_v57, %v614_v58 }
 0x340   :  { %v1034_v30 = vpop.f32.mrb[8].mxu1  ;;  %1161 = vmatprep.subr.bf16.mxu0 %v1160_v5  ;;  %1183 = vmatprep.subr.bf16.mxu1 %v1160_v5 }
 0x341   :  { %v624_v56 = vpop.f32.mrb[9].mxu1  ;;  %1163 = vmatpush3.bf16.msra.mxu0 %v1160_v5  ;;  %1191 = vmatpush3.bf16.msra.mxu1 %v1160_v5 }
 0x342   :  { %v1164_v36 = vpack.c.bf16 %v1034_v30, %v624_v56 }
 0x344   :  { %v1037_v62 = vpop.f32.mrb[10].mxu1  ;;  %1165 = vmatprep.subr.bf16.mxu0 %v1164_v36  ;;  %1184 = vmatprep.subr.bf16.mxu1 %v1164_v36 }
 0x345   :  { %v634_v59 = vpop.f32.mrb[11].mxu1  ;;  %1167 = vmatpush3.bf16.msra.mxu0 %v1164_v36  ;;  %1192 = vmatpush3.bf16.msra.mxu1 %v1164_v36 }
 0x346   :  { %v1168_v0 = vpack.c.bf16 %v1037_v62, %v634_v59 }
 0x348   :  { %v1040_v1 = vpop.f32.mrb[12].mxu1  ;;  %1169 = vmatprep.subr.bf16.mxu0 %v1168_v0  ;;  %1185 = vmatprep.subr.bf16.mxu1 %v1168_v0 }
 0x349   :  { %v644_v2 = vpop.f32.mrb[13].mxu1  ;;  %1171 = vmatpush3.bf16.msra.mxu0 %v1168_v0  ;;  %1193 = vmatpush3.bf16.msra.mxu1 %v1168_v0 }
 0x34a   :  { %v1172_v3 = vpack.c.bf16 %v1040_v1, %v644_v2 }
 0x34c   :  { %v1043_v60 = vpop.f32.mrb[14].mxu1  ;;  %1173 = vmatprep.subr.bf16.mxu0 %v1172_v3  ;;  %1186 = vmatprep.subr.bf16.mxu1 %v1172_v3 }
 0x34d   :  { %v654_v4 = vpop.f32.mrb[15].mxu1  ;;  %1175 = vmatpush3.bf16.msra.mxu0 %v1172_v3  ;;  %1194 = vmatpush3.bf16.msra.mxu1 %v1172_v3 }
 0x34e   :  { %v1176_v12 = vpack.c.bf16 %v1043_v60, %v654_v4 }
 0x350   :  { %1177 = vmatprep.subr.bf16.mxu0 %v1176_v12  ;;  %1187 = vmatprep.subr.bf16.mxu1 %v1176_v12 }
 0x351   :  { %1179 = vmatpush3.bf16.msra.mxu0 %v1176_v12  ;;  %1195 = vmatpush3.bf16.msra.mxu1 %v1176_v12 }
 0x354   :  { %1077 = vmatmul.mubr.f32.vlgmr.msra.gmra.mrb[16].mxu0 %v1579_v61  ;;  %1095 = vmatmul.mubr.f32.vlgmr.msra.gmra.mrb[16].mxu1 %v1612_v63 }
 0x355   :  { %1079 = vmatprep.mubr.f32.mxu0 %v1581_v32  ;;  %1097 = vmatprep.mubr.f32.mxu1 %v1614_v22 }
 0x358   :  { %1080 = vmatmul.mubr.f32.gmra.mrb[18].mxu0 %v1585_v25  ;;  %1098 = vmatmul.mubr.f32.gmra.mrb[18].mxu1 %v1618_v43 }
 0x359   :  { %1082 = vmatprep.mubr.f32.mxu0 %v1587_v20 }
 0x35c   :  { %1083 = vmatmul.mubr.f32.gmra.mrb[20].mxu0 %v1591_v39 }
 0x35d   :  { %1085 = vmatprep.mubr.f32.mxu0 %v1593_v33 }
 0x360   :  { %1086 = vmatmul.mubr.f32.gmra.mrb[22].mxu0 %v1597_v34 }
 0x361   :  { %1088 = vmatprep.mubr.f32.mxu0 %v1599_v35 }
 0x364   :  { %1089 = vmatmul.mubr.f32.gmra.mrb[24].mxu0 %v1603_v37 }
 0x365   :  { %1091 = vmatprep.mubr.f32.mxu0 %v1605_v40 }
 0x368   :  { %1092 = vmatmul.mubr.f32.gmra.mrb[26].mxu0 %v1609_v41 }
 0x427   :  { %v1078_v6 = vpop.f32.mrb[16].mxu0  ;;  %v1096_v38 = vpop.f32.mrb[16].mxu1 }
 0x428   :  { %809 = vst [vmem:[#allocation5 + $0x8] sm:$0xff] %v1078_v6  ;;  %v729_v7 = vpop.f32.mrb[17].mxu0  ;;  %821 = vst [vmem:[#allocation5 + $0x68] sm:$0xff] %v1096_v38  ;;  %v789_v44 = vpop.f32.mrb[17].mxu1 }
 0x429   :  { %808 = vst [vmem:[#allocation5] sm:$0xff] %v729_v7  ;;  %820 = vst [vmem:[#allocation5 + $0x60] sm:$0xff] %v789_v44 }
 0x42b   :  { %v1081_v8 = vpop.f32.mrb[18].mxu0  ;;  %v1099_v9 = vpop.f32.mrb[18].mxu1 }
 0x42c   :  { %811 = vst [vmem:[#allocation5 + $0x18] sm:$0xff] %v1081_v8  ;;  %v739_v10 = vpop.f32.mrb[19].mxu0  ;;  %823 = vst [vmem:[#allocation5 + $0x78] sm:$0xff] %v1099_v9  ;;  %v799_v11 = vpop.f32.mrb[19].mxu1 }
 0x42d   :  { %810 = vst [vmem:[#allocation5 + $0x10] sm:$0xff] %v739_v10  ;;  %822 = vst [vmem:[#allocation5 + $0x70] sm:$0xff] %v799_v11 }
 0x42f   :  { %v1084_v13 = vpop.f32.mrb[20].mxu0 }
 0x430   :  { %813 = vst [vmem:[#allocation5 + $0x28] sm:$0xff] %v1084_v13  ;;  %v749_v15 = vpop.f32.mrb[21].mxu0 }
 0x431   :  { %812 = vst [vmem:[#allocation5 + $0x20] sm:$0xff] %v749_v15 }
 0x433   :  { %v1087_v16 = vpop.f32.mrb[22].mxu0 }
 0x434   :  { %815 = vst [vmem:[#allocation5 + $0x38] sm:$0xff] %v1087_v16  ;;  %v759_v17 = vpop.f32.mrb[23].mxu0 }
 0x435   :  { %814 = vst [vmem:[#allocation5 + $0x30] sm:$0xff] %v759_v17 }
 0x437   :  { %v1090_v46 = vpop.f32.mrb[24].mxu0 }
 0x438   :  { %817 = vst [vmem:[#allocation5 + $0x48] sm:$0xff] %v1090_v46  ;;  %v769_v18 = vpop.f32.mrb[25].mxu0 }
 0x439   :  { %816 = vst [vmem:[#allocation5 + $0x40] sm:$0xff] %v769_v18 }
 0x43b   :  { %v1093_v19 = vpop.f32.mrb[26].mxu0 }
 0x43c   :  { %819 = vst [vmem:[#allocation5 + $0x58] sm:$0xff] %v1093_v19  ;;  %v779_v53 = vpop.f32.mrb[27].mxu0 }
 0x43d   :  { %818 = vst [vmem:[#allocation5 + $0x50] sm:$0xff] %v779_v53 }
 0x43e   :  { %1265 = shalt.err (!%p1262_p12)
}
 0x43f   :  { %s1266_s18 = scalar_lea.hbm %s1656_s6, 2048 }
 0x440   :  { %p1267_p13 = scmp.ne.s32.totalorder %s1656_s6, %s1266_s18  ;;  %p1270_p0 = scmp.lt.u32.totalorder %s1266_s18, %s1656_s6 }
 0x442   :  { %p1272_p1 = pnand %p1270_p0, %p1267_p13 }
 0x444   :  { %1275 = shalt.err (!%p1272_p1)
}
 0x445   :  { %835 = dma.vmem_to_hbm [thread:$0]  %s830_s4, 2048, %s1656_s6, [#allocation4], %s1281_s7, %s1281_s7, %s1282_s8  }
 0x446   :  { %1278 = dma.done.wait [#allocation4], 2048  }
 0x447   :  { %1279 = vsyncadd [#allocation4], 4294965248 }
 0x448   :  { %839 = vsyncpa [#allocation3], 1 }
 0x449   :  { %840 = vsyncpa [#allocation4], 1 }

</bundles_post_ra>
